<compile_context>
chip_gen: v7x
topology: tpu7x:2x2x1
jax: 0.10.0
libtpu: 0.0.40
codegen_flags: <defaults>
</compile_context>

<pallas_src>
import jax
import jax.numpy as jnp
from jax.experimental import pallas as pl
from jax.experimental.pallas import tpu as pltpu

# ----- config (mirrors `args`) -----
BATCH        = 2
N_AGENTS     = 4
INPUT_SHAPE  = 16
HIDDEN_DIM   = 32
MSG_HIDDEN   = 32          # torch module only works if msg_hidden_dim == hidden_dim
N_ACTIONS    = 8
NUM_LAYERS   = 2           # message_passes (> 0)

TOTAL_ROWS   = BATCH * N_AGENTS   # 8 rows == one full sublane group

assert MSG_HIDDEN == HIDDEN_DIM
assert NUM_LAYERS > 0

# ----- packed parameter slab layout (sublane offsets, 8-row aligned) -----
# main slab: (128, HIDDEN_DIM) f32
_ENC_W0, _ENC_W1 = 0, 16           # W_enc  (16, 32)
_ENC_B           = 16              # b_enc  (1, 32)   rows 16:24 padded
_MSG_W0, _MSG_W1 = 24, 56          # W_msg  (32, 32)
_POL_E0, _POL_E1 = 56, 88          # W_pol[:H]  (acts on enc)
_POL_M0, _POL_M1 = 88, 120         # W_pol[H:]  (acts on msg)
_POL_B           = 120             # b_pol  (1, 32)   rows 120:128 padded
_MAIN_ROWS       = 128
# action slab: (40, N_ACTIONS) f32
_ACT_W0, _ACT_W1 = 0, 32           # W_act  (32, 8)
_ACT_B           = 32              # b_act  (1, 8)    rows 32:40 padded
_ACT_ROWS        = 40


def gnn_agent_kernel(x_ref, adj_ref, wm_ref, wa_ref, actions_ref, h_ref):
    # Whole problem handled in one invocation (block-diagonal adjacency).
    x   = x_ref[...]                                   # (R, F)
    adj = adj_ref[...]                                 # (R, R) block-diagonal

    # static slab views (zero-cost slices of the resident VMEM slab)
    w_enc     = wm_ref[_ENC_W0:_ENC_W1, :]             # (F, H)
    b_enc     = wm_ref[_ENC_B:_ENC_B + 1, :]           # (1, H)
    w_msg     = wm_ref[_MSG_W0:_MSG_W1, :]             # (H, H)
    w_pol_enc = wm_ref[_POL_E0:_POL_E1, :]             # (H, H)
    w_pol_msg = wm_ref[_POL_M0:_POL_M1, :]             # (H, H)
    b_pol     = wm_ref[_POL_B:_POL_B + 1, :]           # (1, H)
    w_act     = wa_ref[_ACT_W0:_ACT_W1, :]             # (H, A)
    b_act     = wa_ref[_ACT_B:_ACT_B + 1, :]           # (1, A)

    # encoder: Linear + ReLU
    enc = jnp.maximum(
        jnp.dot(x, w_enc, preferred_element_type=jnp.float32) + b_enc, 0.0)  # (R, H)

    # message passing: msg = ReLU((adj @ msg) @ W_msg), NUM_LAYERS times.
    # Both products run on the MXU (tiny (R,R)@(R,H) and (R,H)@(H,H) passes).
    msg = enc
    for _ in range(NUM_LAYERS):
        agg = jnp.dot(adj, msg, preferred_element_type=jnp.float32)          # (R, H)
        msg = jnp.maximum(
            jnp.dot(agg, w_msg, preferred_element_type=jnp.float32), 0.0)

    # policy head: cat(enc, msg) @ W_pol == enc @ W_pol[:H] + msg @ W_pol[H:]
    h = jnp.maximum(
        jnp.dot(enc, w_pol_enc, preferred_element_type=jnp.float32)
        + jnp.dot(msg, w_pol_msg, preferred_element_type=jnp.float32)
        + b_pol, 0.0)                                                        # (R, H)

    # action head
    actions = (jnp.dot(h, w_act, preferred_element_type=jnp.float32)
               + b_act)                                                      # (R, A)

    actions_ref[...] = actions
    h_ref[...]       = h


def _block_diag_adj(adj):
    """(B, N, N) per-batch adjacency -> (B*N, B*N) block-diagonal adjacency."""
    B, N, _ = adj.shape
    eye_b = jnp.eye(B, dtype=adj.dtype)                         # (B, B)
    bd = eye_b[:, None, :, None] * adj[:, :, None, :]           # (B, N, B, N)
    return bd.reshape(B * N, B * N)


def pack_params(params):
    """Coalesce the 9 Linear weights/biases into two lane-32 / lane-8 slabs."""
    def pad_rows(a, rows):
        return jnp.pad(a, ((0, rows - a.shape[0]), (0, 0)))
    w_main = jnp.concatenate([
        params["w_enc"],                        # rows   0:16
        pad_rows(params["b_enc"], 8),           # rows  16:24
        params["w_msg"],                        # rows  24:56
        params["w_pol"][:HIDDEN_DIM],           # rows  56:88   (enc part)
        params["w_pol"][HIDDEN_DIM:],           # rows  88:120  (msg part)
        pad_rows(params["b_pol"], 8),           # rows 120:128
    ], axis=0).astype(jnp.float32)              # (128, 32)
    w_act = jnp.concatenate([
        params["w_act"],                        # rows   0:32
        pad_rows(params["b_act"], 8),           # rows  32:40
    ], axis=0).astype(jnp.float32)              # (40, 8)
    assert w_main.shape == (_MAIN_ROWS, HIDDEN_DIM)
    assert w_act.shape == (_ACT_ROWS, N_ACTIONS)
    return w_main, w_act


@jax.jit
def gnn_agent_forward(x, adj, w_main, w_act):
    """x: (B*n_agents, F) float32, adj: (B, n_agents, n_agents).
    Returns (actions, h) with shapes (B*n_agents, n_actions), (B*n_agents, H)."""
    # TODO(synk): normalize_adj_matrix=True path (calc_adjacency_hat) and the
    # use_graph_attention=True branch (nn.MultiHeadAttention) are not implemented.
    adj_bd = _block_diag_adj(adj.astype(jnp.float32))           # (R, R)

    vmem = pltpu.MemorySpace.VMEM
    actions, h = pl.pallas_call(
        gnn_agent_kernel,
        # no grid: single invocation, whole arrays resident in VMEM (no pipelining)
        in_specs=[pl.BlockSpec(memory_space=vmem)] * 4,
        out_specs=(pl.BlockSpec(memory_space=vmem),
                   pl.BlockSpec(memory_space=vmem)),
        out_shape=(jax.ShapeDtypeStruct((TOTAL_ROWS, N_ACTIONS), jnp.float32),
                   jax.ShapeDtypeStruct((TOTAL_ROWS, HIDDEN_DIM), jnp.float32)),
    )(x, adj_bd, w_main, w_act)
    return actions, h


def init_params(key):
    ks = jax.random.split(key, 7)
    s = 0.1
    return {
        # weights stored (in, out) == PyTorch Linear weight transposed
        "w_enc": s * jax.random.normal(ks[0], (INPUT_SHAPE, HIDDEN_DIM), jnp.float32),
        "b_enc": s * jax.random.normal(ks[1], (1, HIDDEN_DIM), jnp.float32),
        "w_msg": s * jax.random.normal(ks[2], (MSG_HIDDEN, MSG_HIDDEN), jnp.float32),
        # stacked policy weight for cat(enc, msg): rows [0:H] act on enc, [H:2H] on msg
        "w_pol": s * jax.random.normal(ks[3], (HIDDEN_DIM + MSG_HIDDEN, HIDDEN_DIM), jnp.float32),
        "b_pol": s * jax.random.normal(ks[4], (1, HIDDEN_DIM), jnp.float32),
        "w_act": s * jax.random.normal(ks[5], (HIDDEN_DIM, N_ACTIONS), jnp.float32),
        "b_act": s * jax.random.normal(ks[6], (1, N_ACTIONS), jnp.float32),
    }


def reference_forward(x, adj, p):
    """Pure-JAX reference mirroring the torch forward exactly."""
    enc = jax.nn.relu(x @ p["w_enc"] + p["b_enc"])
    msg = enc.reshape(-1, N_AGENTS, HIDDEN_DIM)
    for _ in range(NUM_LAYERS):
        msg = jax.nn.relu(jnp.einsum("bij,bjh->bih", adj, msg) @ p["w_msg"])
    msg = msg.reshape(-1, HIDDEN_DIM)
    cat = jnp.concatenate([enc, msg], axis=-1)
    h = jax.nn.relu(cat @ p["w_pol"] + p["b_pol"])
    actions = h @ p["w_act"] + p["b_act"]
    return actions, h


if __name__ == "__main__":
    key = jax.random.PRNGKey(0)
    k_x, k_adj, k_p = jax.random.split(key, 3)

    x = jax.random.normal(k_x, (BATCH * N_AGENTS, INPUT_SHAPE), jnp.float32)
    # random symmetric 0/1 adjacency with self loops
    a = (jax.random.uniform(k_adj, (BATCH, N_AGENTS, N_AGENTS)) > 0.5).astype(jnp.float32)
    adj = jnp.clip(a + jnp.transpose(a, (0, 2, 1)) + jnp.eye(N_AGENTS)[None], 0.0, 1.0)

    params = init_params(k_p)
    w_main, w_act = pack_params(params)   # pack once, outside the per-step path

    actions, h = gnn_agent_forward(x, adj, w_main, w_act)
    actions, h = jax.block_until_ready((actions, h))

    ref_actions, ref_h = reference_forward(x, adj, params)
    assert actions.shape == (BATCH * N_AGENTS, N_ACTIONS)
    assert h.shape == (BATCH * N_AGENTS, HIDDEN_DIM)
    assert jnp.allclose(actions, ref_actions, atol=1e-5, rtol=1e-5)
    assert jnp.allclose(h, ref_h, atol=1e-5, rtol=1e-5)

    print("KERNEL_OK")
</pallas_src>

<mosaic_0001>
module attributes {stable_mosaic.version = 11 : i64} {
  func.func @gnn_agent_kernel(%arg0: memref<8x16xf32, #tpu.memory_space<vmem>>, %arg1: memref<8x8xf32, #tpu.memory_space<vmem>>, %arg2: memref<128x32xf32, #tpu.memory_space<vmem>>, %arg3: memref<40x8xf32, #tpu.memory_space<vmem>>, %arg4: memref<8x8xf32, #tpu.memory_space<vmem>>, %arg5: memref<8x32xf32, #tpu.memory_space<vmem>>) attributes {dimension_semantics = [], scalar_prefetch = 0 : i64, scratch_operands = 0 : i64, tpu.core_type = #tpu.core_type<tc>} {
    %c0 = arith.constant 0 : index
    %c0_0 = arith.constant 0 : index
    %0 = vector.load %arg0[%c0, %c0_0] : memref<8x16xf32, #tpu.memory_space<vmem>>, vector<8x16xf32>
    %c0_1 = arith.constant 0 : index
    %c0_2 = arith.constant 0 : index
    %1 = vector.load %arg1[%c0_1, %c0_2] : memref<8x8xf32, #tpu.memory_space<vmem>>, vector<8x8xf32>
    %c0_3 = arith.constant 0 : index
    %c0_4 = arith.constant 0 : index
    %2 = vector.load %arg2[%c0_3, %c0_4] : memref<128x32xf32, #tpu.memory_space<vmem>>, vector<16x32xf32>
    %c16 = arith.constant 16 : index
    %c0_5 = arith.constant 0 : index
    %3 = vector.load %arg2[%c16, %c0_5] : memref<128x32xf32, #tpu.memory_space<vmem>>, vector<1x32xf32>
    %c24 = arith.constant 24 : index
    %c0_6 = arith.constant 0 : index
    %4 = vector.load %arg2[%c24, %c0_6] : memref<128x32xf32, #tpu.memory_space<vmem>>, vector<32x32xf32>
    %c56 = arith.constant 56 : index
    %c0_7 = arith.constant 0 : index
    %5 = vector.load %arg2[%c56, %c0_7] : memref<128x32xf32, #tpu.memory_space<vmem>>, vector<32x32xf32>
    %c88 = arith.constant 88 : index
    %c0_8 = arith.constant 0 : index
    %6 = vector.load %arg2[%c88, %c0_8] : memref<128x32xf32, #tpu.memory_space<vmem>>, vector<32x32xf32>
    %c120 = arith.constant 120 : index
    %c0_9 = arith.constant 0 : index
    %7 = vector.load %arg2[%c120, %c0_9] : memref<128x32xf32, #tpu.memory_space<vmem>>, vector<1x32xf32>
    %c0_10 = arith.constant 0 : index
    %c0_11 = arith.constant 0 : index
    %8 = vector.load %arg3[%c0_10, %c0_11] : memref<40x8xf32, #tpu.memory_space<vmem>>, vector<32x8xf32>
    %c32 = arith.constant 32 : index
    %c0_12 = arith.constant 0 : index
    %9 = vector.load %arg3[%c32, %c0_12] : memref<40x8xf32, #tpu.memory_space<vmem>>, vector<1x8xf32>
    %cst = arith.constant dense<0.000000e+00> : vector<8x32xf32>
    %10 = tpu.matmul %0, %2, %cst {dimension_numbers = #tpu.dot_dimension_numbers<[1], [0], [0], [1], [0, 0, 1, 1], [], []>} : vector<8x16xf32>, vector<16x32xf32>, vector<8x32xf32> -> vector<8x32xf32>
    %11 = vector.broadcast %3 : vector<1x32xf32> to vector<8x32xf32>
    %12 = arith.addf %10, %11 : vector<8x32xf32>
    %cst_13 = arith.constant 0.000000e+00 : f32
    %13 = vector.broadcast %cst_13 : f32 to vector<8x32xf32>
    %14 = arith.maximumf %12, %13 : vector<8x32xf32>
    %cst_14 = arith.constant dense<0.000000e+00> : vector<8x32xf32>
    %15 = tpu.matmul %1, %14, %cst_14 {dimension_numbers = #tpu.dot_dimension_numbers<[1], [0], [0], [1], [0, 0, 1, 1], [], []>} : vector<8x8xf32>, vector<8x32xf32>, vector<8x32xf32> -> vector<8x32xf32>
    %cst_15 = arith.constant dense<0.000000e+00> : vector<8x32xf32>
    %16 = tpu.matmul %15, %4, %cst_15 {dimension_numbers = #tpu.dot_dimension_numbers<[1], [0], [0], [1], [0, 0, 1, 1], [], []>} : vector<8x32xf32>, vector<32x32xf32>, vector<8x32xf32> -> vector<8x32xf32>
    %cst_16 = arith.constant 0.000000e+00 : f32
    %17 = vector.broadcast %cst_16 : f32 to vector<8x32xf32>
    %18 = arith.maximumf %16, %17 : vector<8x32xf32>
    %cst_17 = arith.constant dense<0.000000e+00> : vector<8x32xf32>
    %19 = tpu.matmul %1, %18, %cst_17 {dimension_numbers = #tpu.dot_dimension_numbers<[1], [0], [0], [1], [0, 0, 1, 1], [], []>} : vector<8x8xf32>, vector<8x32xf32>, vector<8x32xf32> -> vector<8x32xf32>
    %cst_18 = arith.constant dense<0.000000e+00> : vector<8x32xf32>
    %20 = tpu.matmul %19, %4, %cst_18 {dimension_numbers = #tpu.dot_dimension_numbers<[1], [0], [0], [1], [0, 0, 1, 1], [], []>} : vector<8x32xf32>, vector<32x32xf32>, vector<8x32xf32> -> vector<8x32xf32>
    %cst_19 = arith.constant 0.000000e+00 : f32
    %21 = vector.broadcast %cst_19 : f32 to vector<8x32xf32>
    %22 = arith.maximumf %20, %21 : vector<8x32xf32>
    %cst_20 = arith.constant dense<0.000000e+00> : vector<8x32xf32>
    %23 = tpu.matmul %14, %5, %cst_20 {dimension_numbers = #tpu.dot_dimension_numbers<[1], [0], [0], [1], [0, 0, 1, 1], [], []>} : vector<8x32xf32>, vector<32x32xf32>, vector<8x32xf32> -> vector<8x32xf32>
    %cst_21 = arith.constant dense<0.000000e+00> : vector<8x32xf32>
    %24 = tpu.matmul %22, %6, %cst_21 {dimension_numbers = #tpu.dot_dimension_numbers<[1], [0], [0], [1], [0, 0, 1, 1], [], []>} : vector<8x32xf32>, vector<32x32xf32>, vector<8x32xf32> -> vector<8x32xf32>
    %25 = arith.addf %23, %24 : vector<8x32xf32>
    %26 = vector.broadcast %7 : vector<1x32xf32> to vector<8x32xf32>
    %27 = arith.addf %25, %26 : vector<8x32xf32>
    %cst_22 = arith.constant 0.000000e+00 : f32
    %28 = vector.broadcast %cst_22 : f32 to vector<8x32xf32>
    %29 = arith.maximumf %27, %28 : vector<8x32xf32>
    %cst_23 = arith.constant dense<0.000000e+00> : vector<8x8xf32>
    %30 = tpu.matmul %29, %8, %cst_23 {dimension_numbers = #tpu.dot_dimension_numbers<[1], [0], [0], [1], [0, 0, 1, 1], [], []>} : vector<8x32xf32>, vector<32x8xf32>, vector<8x8xf32> -> vector<8x8xf32>
    %31 = vector.broadcast %9 : vector<1x8xf32> to vector<8x8xf32>
    %32 = arith.addf %30, %31 : vector<8x8xf32>
    %c0_24 = arith.constant 0 : index
    %c0_25 = arith.constant 0 : index
    %33 = vector.load %arg4[%c0_24, %c0_25] : memref<8x8xf32, #tpu.memory_space<vmem>>, vector<8x8xf32>
    tpu.vector_store %arg4[%c0_24, %c0_25], %32 {strides = array<i32>} : memref<8x8xf32, #tpu.memory_space<vmem>>, vector<8x8xf32>,
    %c0_26 = arith.constant 0 : index
    %c0_27 = arith.constant 0 : index
    %34 = vector.load %arg5[%c0_26, %c0_27] : memref<8x32xf32, #tpu.memory_space<vmem>>, vector<8x32xf32>
    tpu.vector_store %arg5[%c0_26, %c0_27], %29 {strides = array<i32>} : memref<8x32xf32, #tpu.memory_space<vmem>>, vector<8x32xf32>,
    return
  }
}

</mosaic_0001>

<bundles_post_ra>
// kernel: gnn_agent_forward.1
= control target key start
LH: loop header
LB: loop body
LE: loop exit
PB: predicated region body
PF: predicated region fallthrough
CT: control target
= control target key end

     0   :  { %11 = vsyncpa [#allocation3], 0  ;;  %v876_v2 = vmov 0.0|0.0   ;;  %vm877_vm0 = vmmov 0   ;;  %v878_v4 = vmov 0.0   ;;  %s1042_s0 = inlined_call_operand.vmem [shape: f32[8,16], index: 0, kind: input, shape index: {}]   ;;  %s1043_s1 = inlined_call_operand.vmem [shape: f32[8,8], index: 1, kind: input, shape index: {}]   ;;  %s1044_s2 = inlined_call_operand.vmem [shape: f32[128,32], index: 2, kind: input, shape index: {}]   ;;  %s1045_s3 = inlined_call_operand.vmem [shape: f32[40,8], index: 3, kind: input, shape index: {}]   ;;  %s1046_s4 = inlined_call_operand.hbm [shape: f32[8,8], index: 4, kind: output, shape index: {0}]   ;;  %s1047_s5 = inlined_call_operand.hbm [shape: f32[8,32], index: 5, kind: output, shape index: {1}]  }
   0x1   :  { %v23_v0 = vld [vmem:[%s1044_s2] sm:$0xff]  ;;  %v24_v1 = vld [vmem:[%s1044_s2 + $0x8] sm:$0xff]  ;;  %790 = vmatprep.subr.bf16.mxu0 %v876_v2  ;;  %722 = vmatprep.mubr.msk.f32.mxu0 %vm877_vm0, %v878_v4 }
   0x2   :  { %v791_v3 = vpack.c.bf16 %v24_v1, %v23_v0 }
   0x3   :  { %12 = vsyncpa [#allocation5], 0  ;;  %725 = vmatprep.subr.mxu1 %v878_v4  ;;  %727 = vmatprep.mubr.msk.f32.mxu1 %vm877_vm0, %v878_v4  ;;  %v21_v5 = vld [vmem:[%s1042_s0] sm:$0xff]  ;;  %vm48_vm1 = vcmask 130048   ;;  %v675_v6 = vld [vmem:[%s1044_s2 + $0x10] ss:$0 sm:$0xff] }
   0x4   :  { %792 = vmatpush3.bf16.msra.mxu0 %v791_v3  ;;  %v26_v8 = vld [vmem:[%s1044_s2 + $0x18] sm:$0xff]  ;;  %v27_v9 = vld [vmem:[%s1044_s2 + $0x20] sm:$0xff]  ;;  %vm123_vm2 = vcmask 64512   ;;  %v28_v15 = vld [vmem:[%s1044_s2 + $0x28] sm:$0xff]  ;;  %vm197_vm3 = vcmask 261120   ;;  %s879_s9 = smov [#allocation4]  }
   0x5   :  { %741 = vmatprep.subr.mxu0 %v878_v4  ;;  %v22_v13 = vld [vmem:[%s1043_s1] sm:$0xff]  ;;  %v794_v14 = vpack.c.bf16 %v27_v9, %v26_v8  ;;  %v29_v16 = vld [vmem:[%s1044_s2 + $0x30] sm:$0xff]  ;;  %v34_v23 = vld [vmem:[%s1044_s2 + $0x58] sm:$0xff]  ;;  %s663_s1 = sshll.u32 %s879_s9, 4  ;;  %s664_s1 = int_to_ptr.vmem [resolvable:$true] %s663_s1 }
   0x6   :  { %v797_v17 = vpack.c.bf16 %v29_v16, %v28_v15  ;;  %v35_v24 = vld [vmem:[%s1044_s2 + $0x60] sm:$0xff]  ;;  %v30_v26 = vld [vmem:[%s1044_s2 + $0x38] sm:$0xff]  ;;  %v32_v29 = vld [vmem:[%s1044_s2 + $0x48] sm:$0xff]  ;;  %s828_s10 = scalar_lea.vmem %s664_s1, 128  ;;  %p833_p1 = scmp.lt.s32.totalorder %s664_s1, %s664_s1 }
   0x7   :  { %723 = vmatmul.mubr.msk.f32.vlgmr.msra.gmra.mrb[0].mxu0 %vm48_vm1, %v21_v5  ;;  %v806_v25 = vpack.c.bf16 %v35_v24, %v34_v23  ;;  %v31_v27 = vld [vmem:[%s1044_s2 + $0x40] sm:$0xff]  ;;  %v33_v30 = vld [vmem:[%s1044_s2 + $0x50] sm:$0xff]  ;;  %v36_v34 = vld [vmem:[%s1044_s2 + $0x68] sm:$0xff]  ;;  %p829_p0 = scmp.ne.s32.totalorder %s664_s1, %s828_s10  ;;  %p834_p2 = scmp.lt.s32.totalorder %s828_s10, %s828_s10 }
   0x8   :  { %743 = vmatprep.mubr.msk.f32.mxu0 %vm877_vm0, %v878_v4  ;;  %v812_v28 = vpack.c.bf16 %v31_v27, %v30_v26  ;;  %v815_v33 = vpack.c.bf16 %v33_v30, %v32_v29  ;;  %v37_v35 = vld [vmem:[%s1044_s2 + $0x70] sm:$0xff]  ;;  %v39_v42 = vld [vmem:[%s1045_s3] sm:$0xff]  ;;  %v40_v43 = vld [vmem:[%s1045_s3 + $0x8] sm:$0xff] }
   0x9   :  { %v809_v36 = vpack.c.bf16 %v37_v35, %v36_v34  ;;  %v818_v44 = vpack.c.bf16 %v40_v43, %v39_v42  ;;  %v41_v45 = vld [vmem:[%s1045_s3 + $0x10] sm:$0xff]  ;;  %v42_v46 = vld [vmem:[%s1045_s3 + $0x18] sm:$0xff]  ;;  %p835_p3 = por %p834_p2, %p833_p1 }
   0xa   :  { %v821_v47 = vpack.c.bf16 %v42_v46, %v41_v45  ;;  %v683_v48 = vld [vmem:[%s1044_s2 + $0x78] ss:$0 sm:$0xff] }
   0xb   :  { %p836_p4 = pnand %p835_p3, %p829_p0 }
  0xda   :  { %v118_v7 = vpop.f32.mrb[0].mxu0 }
  0xdb   :  { %v119_v10 = vadd.f32 %v675_v6, %v118_v7  ;;  %v724_v11 = vpop.f32.mrb[1].mxu0 }
  0xdd   :  { %v122_v12 = vmax.f32 %v119_v10, 0.0 }
  0xdf   :  { %726 = vmatpush3.msra.mxu1 %v122_v12 }
  0xe0   :  { %728 = vmatmul.mubr.msk.f32.vlgmr.msra.gmra.mrb[0].mxu1 %vm123_vm2, %v22_v13  ;;  %793 = vmatprep.subr.bf16.mxu1 %v876_v2 }
  0xe1   :  { %795 = vmatpush3.bf16.msra.mxu1 %v794_v14  ;;  %738 = vmatprep.mubr.msk.f32.mxu1 %vm877_vm0, %v878_v4 }
  0xe2   :  { %796 = vmatprep.subr.bf16.mxu1 %v876_v2 }
  0xe5   :  { %798 = vmatpush3.bf16.msra.mxu1 %v797_v17 }
  0xe6   :  { %805 = vmatprep.subr.bf16.mxu1 %v876_v2 }
 0x1b3   :  { %v193_v18 = vpop.f32.mrb[0].mxu1 }
 0x1b4   :  { %v729_v19 = vpop.f32.mrb[1].mxu1  ;;  %739 = vmatmul.mubr.msk.f32.vlgmr.msra.gmra.mrb[2].mxu1 %vm197_vm3, %v193_v18 }
 0x1b5   :  { %765 = vmatprep.mubr.msk.f32.mxu1 %vm877_vm0, %v878_v4  ;;  %807 = vmatpush3.bf16.msra.mxu1 %v806_v25 }
 0x1b6   :  { %808 = vmatprep.subr.bf16.mxu1 %v876_v2 }
 0x1b9   :  { %810 = vmatpush3.bf16.msra.mxu1 %v809_v36 }
 0x1ba   :  { %817 = vmatprep.subr.bf16.mxu1 %v876_v2 }
 0x287   :  { %v267_v20 = vpop.f32.mrb[2].mxu1 }
 0x288   :  { %v271_v21 = vmax.f32 %v267_v20, 0.0  ;;  %v740_v22 = vpop.f32.mrb[3].mxu1 }
 0x28a   :  { %742 = vmatpush3.msra.mxu0 %v271_v21 }
 0x28b   :  { %744 = vmatmul.mubr.msk.f32.vlgmr.msra.gmra.mrb[2].mxu0 %vm123_vm2, %v22_v13  ;;  %799 = vmatprep.subr.bf16.mxu0 %v876_v2 }
 0x28c   :  { %801 = vmatpush3.bf16.msra.mxu0 %v794_v14  ;;  %754 = vmatprep.mubr.msk.f32.mxu0 %vm877_vm0, %v878_v4 }
 0x28d   :  { %802 = vmatprep.subr.bf16.mxu0 %v876_v2 }
 0x290   :  { %804 = vmatpush3.bf16.msra.mxu0 %v797_v17 }
 0x291   :  { %811 = vmatprep.subr.bf16.mxu0 %v876_v2 }
 0x35e   :  { %v338_v31 = vpop.f32.mrb[2].mxu0 }
 0x35f   :  { %755 = vmatmul.mubr.msk.f32.vlgmr.msra.gmra.mrb[4].mxu0 %vm197_vm3, %v338_v31  ;;  %v745_v32 = vpop.f32.mrb[3].mxu0 }
 0x360   :  { %813 = vmatpush3.bf16.msra.mxu0 %v812_v28  ;;  %776 = vmatprep.mubr.msk.f32.mxu0 %vm877_vm0, %v878_v4 }
 0x361   :  { %814 = vmatprep.subr.bf16.mxu0 %v876_v2 }
 0x364   :  { %816 = vmatpush3.bf16.msra.mxu0 %v815_v33 }
 0x367   :  { %777 = vmatmul.mubr.msk.f32.vlgmr.msra.gmra.mrb[6].mxu0 %vm197_vm3, %v122_v12 }
 0x432   :  { %v411_v37 = vpop.f32.mrb[4].mxu0 }
 0x433   :  { %v415_v38 = vmax.f32 %v411_v37, 0.0  ;;  %v756_v39 = vpop.f32.mrb[5].mxu0 }
 0x435   :  { %766 = vmatmul.mubr.msk.f32.vlgmr.msra.gmra.mrb[4].mxu1 %vm197_vm3, %v415_v38 }
 0x436   :  { %787 = vmatprep.mubr.msk.f32.mxu1 %vm877_vm0, %v878_v4  ;;  %819 = vmatpush3.bf16.msra.mxu1 %v818_v44 }
 0x437   :  { %820 = vmatprep.subr.bf16.mxu1 %v876_v2 }
 0x43a   :  { %v558_v40 = vpop.f32.mrb[6].mxu0  ;;  %822 = vmatpush3.bf16.msra.mxu1 %v821_v47 }
 0x43b   :  { %v778_v41 = vpop.f32.mrb[7].mxu0 }
 0x508   :  { %v485_v49 = vpop.f32.mrb[4].mxu1 }
 0x509   :  { %v559_v50 = vadd.f32 %v558_v40, %v485_v49  ;;  %v767_v51 = vpop.f32.mrb[5].mxu1 }
 0x50b   :  { %v566_v52 = vadd.f32 %v683_v48, %v559_v50 }
 0x50d   :  { %v567_v53 = vmax.f32 %v566_v52, 0.0 }
 0x50f   :  { %646 = vst.msk [vmem:[#allocation4] sm:$0xff] %vm197_vm3, %v567_v53  ;;  %788 = vmatmul.mubr.msk.f32.vlgmr.msra.gmra.mrb[6].mxu1 %vm197_vm3, %v567_v53 }
 0x510   :  { %839 = shalt.err (!%p836_p4)
}
 0x511   :  { %s840_s12 = scalar_lea.hbm %s1047_s5, 128 }
 0x512   :  { %p841_p5 = scmp.ne.s32.totalorder %s1047_s5, %s840_s12  ;;  %p844_p6 = scmp.lt.u32.totalorder %s840_s12, %s1047_s5 }
 0x514   :  { %p846_p7 = pnand %p844_p6, %p841_p5 }
 0x516   :  { %849 = shalt.err (!%p846_p7)
}
 0x517   :  { %666 = dma.vmem_to_hbm [thread:$0]  %s664_s1, 128, %s1047_s5, [#allocation5]   ;;  %v684_v54 = vld [vmem:[%s1045_s3 + $0x20] ss:$0 sm:$0xff] }
 0x518   :  { %s880_s21 = smov [#allocation2]  }
 0x519   :  { %s653_s22 = sshll.u32 %s880_s21, 4  ;;  %s654_s22 = int_to_ptr.vmem [resolvable:$true] %s653_s22 }
 0x51a   :  { %s850_s23 = scalar_lea.vmem %s654_s22, 128  ;;  %p855_p9 = scmp.lt.s32.totalorder %s654_s22, %s654_s22 }
 0x51b   :  { %p851_p8 = scmp.ne.s32.totalorder %s654_s22, %s850_s23  ;;  %p856_p10 = scmp.lt.s32.totalorder %s850_s23, %s850_s23 }
 0x51d   :  { %p857_p11 = por %p856_p10, %p855_p9 }
 0x51f   :  { %p858_p12 = pnand %p857_p11, %p851_p8 }
 0x5e2   :  { %v641_v55 = vpop.f32.mrb[6].mxu1 }
 0x5e3   :  { %v642_v56 = vadd.f32 %v684_v54, %v641_v55  ;;  %v789_v57 = vpop.f32.mrb[7].mxu1 }
 0x5e5   :  { %645 = vst.msk [vmem:[#allocation2] sm:$0xff] %vm123_vm2, %v642_v56 }
 0x5e6   :  { %861 = shalt.err (!%p858_p12)
}
 0x5e7   :  { %s862_s25 = scalar_lea.hbm %s1046_s4, 128 }
 0x5e8   :  { %p863_p13 = scmp.ne.s32.totalorder %s1046_s4, %s862_s25  ;;  %p866_p0 = scmp.lt.u32.totalorder %s862_s25, %s1046_s4 }
 0x5ea   :  { %p868_p1 = pnand %p866_p0, %p863_p13 }
 0x5ec   :  { %871 = shalt.err (!%p868_p1)
}
 0x5ed   :  { %656 = dma.vmem_to_hbm [thread:$0]  %s654_s22, 128, %s1046_s4, [#allocation3]  }
 0x5ee   :  { %872 = dma.done.wait [#allocation3], 128  }
 0x5ef   :  { %873 = vsyncadd [#allocation3], 4294967168 }
 0x5f0   :  { %874 = dma.done.wait [#allocation5], 128  }
 0x5f1   :  { %875 = vsyncadd [#allocation5], 4294967168 }
 0x5f2   :  { %673 = vsyncpa [#allocation3], 1 }
 0x5f3   :  { %674 = vsyncpa [#allocation5], 1 }

</bundles_post_ra>
